<compile_context>
chip_gen: v5e
topology: v5e:2x2
jax: 0.10.0
libtpu: 0.0.40
codegen_flags: <defaults>
</compile_context>

<pallas_src>
import functools
import math

import jax
import jax.numpy as jnp
from jax import lax
from jax.experimental import pallas as pl
from jax.experimental.pallas import tpu as pltpu


# ------------------------------ helpers -------------------------------------

def _pick_tile(dim, desired, multiple):
    """Largest tile <= desired that divides dim and is a multiple of `multiple`.

    Falls back to the full dim, which is always a legal block shape.
    """
    if dim <= desired:
        return dim
    t = (desired // multiple) * multiple
    while t >= multiple:
        if dim % t == 0:
            return t
        t -= multiple
    # TODO(synk): pad awkward dims instead of falling back to the full dim.
    return dim


@functools.lru_cache(maxsize=None)
def _vmem_limit_bytes():
    """Generation-aware VMEM limit: ~7/8 of physical VMEM, capped at 112 MiB."""
    try:
        cap = int(pltpu.get_tpu_info().vmem_capacity_bytes)
    except Exception:
        return None            # keep Mosaic's default scoped-VMEM limit
    return int(min((cap * 7) // 8, 112 * 1024 * 1024))


def _compiler_params(dimension_semantics):
    return pltpu.CompilerParams(dimension_semantics=dimension_semantics,
                                vmem_limit_bytes=_vmem_limit_bytes())


# ----------------------------- linear kernels --------------------------------

_RESIDENT_W_BYTES = 4 * 1024 * 1024     # keep W resident in VMEM below this


def _linear_resident_kernel(x_ref, w_ref, b_ref, o_ref):
    # Whole (K, N) weight stays resident in VMEM; one bf16 MXU matmul per tile.
    acc = jnp.dot(x_ref[...].astype(jnp.bfloat16), w_ref[...],
                  preferred_element_type=jnp.float32)
    o_ref[...] = (acc + b_ref[...].astype(jnp.float32)).astype(o_ref.dtype)


def _linear_tiled_kernel(x_ref, w_ref, b_ref, o_ref, acc_ref):
    k_idx = pl.program_id(2)

    @pl.when(k_idx == 0)
    def _():
        acc_ref[...] = jnp.zeros(acc_ref.shape, acc_ref.dtype)

    acc_ref[...] += jnp.dot(x_ref[...].astype(jnp.bfloat16), w_ref[...],
                            preferred_element_type=jnp.float32)

    @pl.when(k_idx == pl.num_programs(2) - 1)
    def _():
        o_ref[...] = (acc_ref[...]
                      + b_ref[...].astype(jnp.float32)).astype(o_ref.dtype)


def pallas_linear(x2d, w, b, *, out_dtype=None,
                  tm_desired=512, tn_desired=512, tk_desired=512):
    """y = x2d @ w + b.  x2d: (M, K), w: (K, N) bf16, b: (1, N) f32."""
    M, K = x2d.shape
    N = w.shape[1]
    out_dtype = out_dtype or x2d.dtype
    tm = _pick_tile(M, tm_desired, 8)

    if K * N * w.dtype.itemsize <= _RESIDENT_W_BYTES:
        # Small weights: single M grid axis, weight DMA'd once and kept
        # resident (constant index_map); no accumulator scratch needed.
        return pl.pallas_call(
            _linear_resident_kernel,
            out_shape=jax.ShapeDtypeStruct((M, N), out_dtype),
            grid=(M // tm,),
            in_specs=[
                pl.BlockSpec((tm, K), lambda i: (i, 0)),
                pl.BlockSpec((K, N), lambda i: (0, 0)),
                pl.BlockSpec((1, N), lambda i: (0, 0)),
            ],
            out_specs=pl.BlockSpec((tm, N), lambda i: (i, 0)),
            compiler_params=_compiler_params(("parallel",)),
        )(x2d, w, b)

    tn = _pick_tile(N, tn_desired, 128)
    tk = _pick_tile(K, tk_desired, 128)
    grid = (M // tm, N // tn, K // tk)
    return pl.pallas_call(
        _linear_tiled_kernel,
        out_shape=jax.ShapeDtypeStruct((M, N), out_dtype),
        grid=grid,
        in_specs=[
            pl.BlockSpec((tm, tk), lambda i, j, k: (i, k)),
            pl.BlockSpec((tk, tn), lambda i, j, k: (k, j)),
            pl.BlockSpec((1, tn), lambda i, j, k: (0, j)),
        ],
        out_specs=pl.BlockSpec((tm, tn), lambda i, j, k: (i, j)),
        scratch_shapes=[pltpu.VMEM((tm, tn), jnp.float32)],
        compiler_params=_compiler_params(("parallel", "parallel", "arbitrary")),
    )(x2d, w, b)


def _qkv_fused_kernel(x_ref, wq_ref, wk_ref, wv_ref, bq_ref, bk_ref, bv_ref,
                      q_ref, k_ref, v_ref):
    xb = x_ref[...].astype(jnp.bfloat16)
    for w_ref, b_ref, o_ref in ((wq_ref, bq_ref, q_ref),
                                (wk_ref, bk_ref, k_ref),
                                (wv_ref, bv_ref, v_ref)):
        acc = jnp.dot(xb, w_ref[...], preferred_element_type=jnp.float32)
        o_ref[...] = (acc + b_ref[...].astype(jnp.float32)).astype(o_ref.dtype)


def pallas_qkv_proj(x2d, wq, wk, wv, bq, bk, bv, *, out_dtype=jnp.bfloat16,
                    tm_desired=512):
    """Fused q/k/v projection: x is read once, all three weights stay resident."""
    M, K = x2d.shape
    N = wq.shape[1]
    if 3 * K * N * wq.dtype.itemsize > 2 * _RESIDENT_W_BYTES:
        # Weights too large to keep resident together: three tiled calls.
        return (pallas_linear(x2d, wq, bq, out_dtype=out_dtype),
                pallas_linear(x2d, wk, bk, out_dtype=out_dtype),
                pallas_linear(x2d, wv, bv, out_dtype=out_dtype))

    tm = _pick_tile(M, tm_desired, 8)
    w_spec = pl.BlockSpec((K, N), lambda i: (0, 0))
    b_spec = pl.BlockSpec((1, N), lambda i: (0, 0))
    o_spec = pl.BlockSpec((tm, N), lambda i: (i, 0))
    out_sds = jax.ShapeDtypeStruct((M, N), out_dtype)
    return pl.pallas_call(
        _qkv_fused_kernel,
        out_shape=(out_sds, out_sds, out_sds),
        grid=(M // tm,),
        in_specs=[pl.BlockSpec((tm, K), lambda i: (i, 0)),
                  w_spec, w_spec, w_spec, b_spec, b_spec, b_spec],
        out_specs=(o_spec, o_spec, o_spec),
        compiler_params=_compiler_params(("parallel",)),
    )(x2d, wq, wk, wv, bq, bk, bv)


# --------------------------- attention kernel --------------------------------

def _pick_head_block(num_heads, head_dim, target_lanes=512):
    """Heads per grid step: hb*head_dim lanes, multiple of 128 when possible."""
    best = None
    for hb in range(1, num_heads + 1):
        if num_heads % hb:
            continue
        lanes = hb * head_dim
        if lanes % 128:
            continue
        if lanes <= target_lanes:
            best = hb
        elif best is None:
            best = hb
            break
    return best if best is not None else num_heads


def _make_attention_kernel(hb, head_dim, with_mask):
    def body(q_ref, k_ref, v_ref, mask_ref, o_ref, m_sc, l_sc, acc_sc):
        kv_idx = pl.program_id(3)

        @pl.when(kv_idx == 0)
        def _():
            m_sc[...] = jnp.full(m_sc.shape, -jnp.inf, dtype=m_sc.dtype)
            l_sc[...] = jnp.zeros(l_sc.shape, l_sc.dtype)
            acc_sc[...] = jnp.zeros(acc_sc.shape, acc_sc.dtype)

        q2 = q_ref[0]                           # (tq, hb*hd) bf16, pre-scaled
        k2 = k_ref[0]                           # (tk, hb*hd) bf16
        v2 = v_ref[0]                           # (tk, hb*hd) bf16
        mask = mask_ref[...].astype(jnp.float32) if with_mask else None

        # TODO(synk): for head_dim >= 128 use one batched dot_general over the
        # head axis instead of this unrolled per-head loop.
        for h in range(hb):
            lo = h * head_dim
            hi = lo + head_dim
            qh = q2[:, lo:hi]                   # (tq, hd)
            kh = k2[:, lo:hi]                   # (tk, hd)
            vh = v2[:, lo:hi]                   # (tk, hd)

            s = lax.dot_general(                # (tq, tk) f32, no k transpose
                qh, kh, dimension_numbers=(((1,), (1,)), ((), ())),
                preferred_element_type=jnp.float32)
            if with_mask:
                s = s + mask

            m_prev = m_sc[h]                    # (tq, 1)
            m_new = jnp.maximum(m_prev, jnp.max(s, axis=-1, keepdims=True))
            alpha = jnp.exp(m_prev - m_new)
            p = jnp.exp(s - m_new)              # (tq, tk) f32
            l_sc[h] = alpha * l_sc[h] + jnp.sum(p, axis=-1, keepdims=True)
            pv = jnp.dot(p.astype(vh.dtype), vh,
                         preferred_element_type=jnp.float32)   # (tq, hd)
            acc_sc[h] = alpha * acc_sc[h] + pv
            m_sc[h] = m_new

        @pl.when(kv_idx == pl.num_programs(3) - 1)
        def _():
            inv_l = pl.reciprocal(l_sc[...], approx=True)      # EUP slot
            o_ref[0] = (acc_sc[...] * inv_l).astype(o_ref.dtype)

    if with_mask:
        def kernel(q_ref, k_ref, v_ref, mask_ref, o_ref, m_sc, l_sc, acc_sc):
            body(q_ref, k_ref, v_ref, mask_ref, o_ref, m_sc, l_sc, acc_sc)
    else:
        def kernel(q_ref, k_ref, v_ref, o_ref, m_sc, l_sc, acc_sc):
            body(q_ref, k_ref, v_ref, None, o_ref, m_sc, l_sc, acc_sc)
    return kernel


def pallas_scaled_dot_product(q, k, v, num_heads, mask=None, *,
                              tq_desired=512, tk_desired=512):
    """q, k, v: (B, S, H*hd) head-major layout; returns values as (B, H, S, hd).

    1/sqrt(head_dim) is assumed already folded into q (done at param prep).
    """
    B, S, D = q.shape
    hd = D // num_heads
    hb = _pick_head_block(num_heads, hd)
    tq = _pick_tile(S, tq_desired, 8)
    # tk is also the mask block's lane dim, so keep it 128-aligned (or full S).
    tk = S if S <= tk_desired else _pick_tile(S, tk_desired, 128)
    grid = (B, num_heads // hb, S // tq, S // tk)
    hD = hb * hd

    q_spec = pl.BlockSpec((1, tq, hD), lambda b, h, qi, ki: (b, qi, h))
    kv_spec = pl.BlockSpec((1, tk, hD), lambda b, h, qi, ki: (b, ki, h))
    in_specs = [q_spec, kv_spec, kv_spec]
    args = [q, k, v]
    if mask is not None:
        # TODO(synk): for causal masks, build the mask from iota in-kernel and
        # skip fully-masked kv tiles instead of streaming an (S, S) array.
        in_specs.append(pl.BlockSpec((tq, tk), lambda b, h, qi, ki: (qi, ki)))
        args.append(mask.astype(jnp.float32))

    kernel = _make_attention_kernel(hb, hd, mask is not None)

    # TODO(synk): sweep pl.Buffered(3) on the k/v specs if the profile shows
    # exposed DMA between kv steps.
    return pl.pallas_call(
        kernel,
        out_shape=jax.ShapeDtypeStruct((B, num_heads, S, hd), q.dtype),
        grid=grid,
        in_specs=in_specs,
        out_specs=pl.BlockSpec((1, hb, tq, hd),
                               lambda b, h, qi, ki: (b, h, qi, 0)),
        scratch_shapes=[
            pltpu.VMEM((hb, tq, 1), jnp.float32),    # running max m
            pltpu.VMEM((hb, tq, 1), jnp.float32),    # running sum l
            pltpu.VMEM((hb, tq, hd), jnp.float32),   # output accumulator
        ],
        compiler_params=_compiler_params(
            ("parallel", "parallel", "parallel", "arbitrary")),
    )(*args)


# ------------------------------ module forward --------------------------------

def prepare_params(raw, num_heads):
    """Split/scale the PyTorch-layout parameters once for the Pallas kernels.

    w_qkv columns are per-head [q|k|v] interleaved (PyTorch reshape order);
    we extract head-major (D, D) w_q/w_k/w_v in bf16, folding 1/sqrt(hd) into
    w_q / b_q.  Biases stay f32.
    """
    D = raw["w_qkv"].shape[0]
    hd = D // num_heads
    sm = 1.0 / math.sqrt(hd)
    w = raw["w_qkv"].reshape(D, num_heads, 3, hd)
    b = raw["b_qkv"].reshape(1, num_heads, 3, hd)
    return {
        "w_q": (w[:, :, 0, :] * sm).reshape(D, D).astype(jnp.bfloat16),
        "w_k": w[:, :, 1, :].reshape(D, D).astype(jnp.bfloat16),
        "w_v": w[:, :, 2, :].reshape(D, D).astype(jnp.bfloat16),
        "b_q": (b[:, :, 0, :] * sm).reshape(1, D).astype(jnp.float32),
        "b_k": b[:, :, 1, :].reshape(1, D).astype(jnp.float32),
        "b_v": b[:, :, 2, :].reshape(1, D).astype(jnp.float32),
        "w_out": raw["w_out"].astype(jnp.bfloat16),
        "b_out": raw["b_out"].astype(jnp.float32),
    }


def multi_head_attention(x, prepared, num_heads, mask=None):
    """Pallas implementation of MultiHeadAttention.forward."""
    B, S, D = x.shape
    hd = D // num_heads
    x2d = x.reshape(B * S, D)

    # Fused q/k/v projection: x read once, weights resident, bf16 outputs in
    # (B, S, H*hd) head-major layout (no HBM transpose needed afterwards).
    q, k, v = pallas_qkv_proj(x2d, prepared["w_q"], prepared["w_k"],
                              prepared["w_v"], prepared["b_q"],
                              prepared["b_k"], prepared["b_v"],
                              out_dtype=jnp.bfloat16)
    q = q.reshape(B, S, D)
    k = k.reshape(B, S, D)
    v = v.reshape(B, S, D)

    values = pallas_scaled_dot_product(q, k, v, num_heads, mask)  # (B,H,S,hd)

    # Reference quirk: (B, H, S, hd) -> (B, S, H*hd) WITHOUT permuting heads
    # back first.  Row-major flattening, so this reshape is free.
    values = values.reshape(B, S, num_heads * hd)

    out = pallas_linear(values.reshape(B * S, D), prepared["w_out"],
                        prepared["b_out"], out_dtype=jnp.float32)
    return out.reshape(B, S, D)


# --------------------------- reference (plain JAX) ----------------------------

def reference_mha(x, raw, num_heads, mask=None):
    B, S, D = x.shape
    hd = D // num_heads
    qkv = x @ raw["w_qkv"] + raw["b_qkv"]
    qkv = qkv.reshape(B, S, num_heads, 3 * hd).transpose(0, 2, 1, 3)
    q, k, v = jnp.split(qkv, 3, axis=-1)
    scaled = jnp.einsum("bhqd,bhkd->bhqk", q, k) / math.sqrt(hd)
    if mask is not None:
        scaled = scaled + mask
    attn = jax.nn.softmax(scaled, axis=-1)
    values = jnp.einsum("bhqk,bhkd->bhqd", attn, v)
    values = values.reshape(B, S, num_heads * hd)
    return values @ raw["w_out"] + raw["b_out"]


# --------------------------------- main ---------------------------------------

if __name__ == "__main__":
    B, S, d_model, num_heads = 2, 8, 32, 8

    key = jax.random.PRNGKey(0)
    kx, k1, k2, k3, k4 = jax.random.split(key, 5)

    x = jax.random.normal(kx, (B, S, d_model), dtype=jnp.float32)

    scale = 1.0 / math.sqrt(d_model)
    raw_params = {
        "w_qkv": jax.random.uniform(k1, (d_model, 3 * d_model),
                                    minval=-scale, maxval=scale,
                                    dtype=jnp.float32),
        "b_qkv": jax.random.uniform(k2, (1, 3 * d_model),
                                    minval=-scale, maxval=scale,
                                    dtype=jnp.float32),
        "w_out": jax.random.uniform(k3, (d_model, d_model),
                                    minval=-scale, maxval=scale,
                                    dtype=jnp.float32),
        "b_out": jax.random.uniform(k4, (1, d_model),
                                    minval=-scale, maxval=scale,
                                    dtype=jnp.float32),
    }
    params = prepare_params(raw_params, num_heads)

    # --- no-mask path (compiles the mask-free kernel variant) ---
    out = jax.block_until_ready(
        multi_head_attention(x, params, num_heads, mask=None))
    ref = reference_mha(x, raw_params, num_heads, mask=None)
    assert out.shape == (B, S, d_model)
    # bf16 MXU operands -> slightly looser tolerance vs. the f32 reference.
    assert jnp.allclose(out, ref, atol=2e-2, rtol=2e-2), "mismatch (no mask)"

    # --- masked path (additive causal-style mask, shared across batch/heads) ---
    causal = jnp.tril(jnp.ones((S, S), dtype=jnp.float32))
    mask = jnp.where(causal > 0, 0.0, -1e9).astype(jnp.float32)
    out_m = jax.block_until_ready(
        multi_head_attention(x, params, num_heads, mask=mask))
    ref_m = reference_mha(x, raw_params, num_heads, mask=mask)
    assert jnp.allclose(out_m, ref_m, atol=2e-2, rtol=2e-2), "mismatch (mask)"

    print("KERNEL_OK")
</pallas_src>

<mosaic_0001>
module attributes {stable_mosaic.version = 11 : i64} {
  func.func @_qkv_fused_kernel(%arg0: i32, %arg1: memref<16x32xf32, #tpu.memory_space<vmem>>, %arg2: memref<32x32xbf16, #tpu.memory_space<vmem>>, %arg3: memref<32x32xbf16, #tpu.memory_space<vmem>>, %arg4: memref<32x32xbf16, #tpu.memory_space<vmem>>, %arg5: memref<1x32xf32, #tpu.memory_space<vmem>>, %arg6: memref<1x32xf32, #tpu.memory_space<vmem>>, %arg7: memref<1x32xf32, #tpu.memory_space<vmem>>, %arg8: memref<16x32xbf16, #tpu.memory_space<vmem>>, %arg9: memref<16x32xbf16, #tpu.memory_space<vmem>>, %arg10: memref<16x32xbf16, #tpu.memory_space<vmem>>) attributes {dimension_semantics = [#tpu.dimension_semantics<parallel>], iteration_bounds = array<i64: 1>, scalar_prefetch = 0 : i64, scratch_operands = 0 : i64, tpu.core_type = #tpu.core_type<tc>, window_params = [{transform_indices = @transform_0, window_bounds = array<i64: 16, 32>}, {pipeline_mode = #tpu.pipeline_mode<synchronous>, transform_indices = @transform_1, window_bounds = array<i64: 32, 32>}, {pipeline_mode = #tpu.pipeline_mode<synchronous>, transform_indices = @transform_2, window_bounds = array<i64: 32, 32>}, {pipeline_mode = #tpu.pipeline_mode<synchronous>, transform_indices = @transform_3, window_bounds = array<i64: 32, 32>}, {pipeline_mode = #tpu.pipeline_mode<synchronous>, transform_indices = @transform_4, window_bounds = array<i64: 1, 32>}, {pipeline_mode = #tpu.pipeline_mode<synchronous>, transform_indices = @transform_5, window_bounds = array<i64: 1, 32>}, {pipeline_mode = #tpu.pipeline_mode<synchronous>, transform_indices = @transform_6, window_bounds = array<i64: 1, 32>}, {transform_indices = @transform_7, window_bounds = array<i64: 16, 32>}, {transform_indices = @transform_8, window_bounds = array<i64: 16, 32>}, {transform_indices = @transform_9, window_bounds = array<i64: 16, 32>}]} {
    %c0 = arith.constant 0 : index
    %c0_0 = arith.constant 0 : index
    %0 = vector.load %arg1[%c0, %c0_0] : memref<16x32xf32, #tpu.memory_space<vmem>>, vector<16x32xf32>
    %1 = arith.truncf %0 : vector<16x32xf32> to vector<16x32xbf16>
    %c0_1 = arith.constant 0 : index
    %c0_2 = arith.constant 0 : index
    %2 = vector.load %arg2[%c0_1, %c0_2] : memref<32x32xbf16, #tpu.memory_space<vmem>>, vector<32x32xbf16>
    %cst = arith.constant dense<0.000000e+00> : vector<16x32xf32>
    %3 = tpu.matmul %1, %2, %cst {dimension_numbers = #tpu.dot_dimension_numbers<[1], [0], [0], [1], [0, 0, 1, 1], [], []>} : vector<16x32xbf16>, vector<32x32xbf16>, vector<16x32xf32> -> vector<16x32xf32>
    %c0_3 = arith.constant 0 : index
    %c0_4 = arith.constant 0 : index
    %4 = vector.load %arg5[%c0_3, %c0_4] : memref<1x32xf32, #tpu.memory_space<vmem>>, vector<1x32xf32>
    %5 = vector.broadcast %4 : vector<1x32xf32> to vector<16x32xf32>
    %6 = arith.addf %3, %5 : vector<16x32xf32>
    %7 = arith.truncf %6 : vector<16x32xf32> to vector<16x32xbf16>
    %c0_5 = arith.constant 0 : index
    %c0_6 = arith.constant 0 : index
    %8 = vector.load %arg8[%c0_5, %c0_6] : memref<16x32xbf16, #tpu.memory_space<vmem>>, vector<16x32xbf16>
    tpu.vector_store %arg8[%c0_5, %c0_6], %7 {strides = array<i32>} : memref<16x32xbf16, #tpu.memory_space<vmem>>, vector<16x32xbf16>,
    %c0_7 = arith.constant 0 : index
    %c0_8 = arith.constant 0 : index
    %9 = vector.load %arg3[%c0_7, %c0_8] : memref<32x32xbf16, #tpu.memory_space<vmem>>, vector<32x32xbf16>
    %cst_9 = arith.constant dense<0.000000e+00> : vector<16x32xf32>
    %10 = tpu.matmul %1, %9, %cst_9 {dimension_numbers = #tpu.dot_dimension_numbers<[1], [0], [0], [1], [0, 0, 1, 1], [], []>} : vector<16x32xbf16>, vector<32x32xbf16>, vector<16x32xf32> -> vector<16x32xf32>
    %c0_10 = arith.constant 0 : index
    %c0_11 = arith.constant 0 : index
    %11 = vector.load %arg6[%c0_10, %c0_11] : memref<1x32xf32, #tpu.memory_space<vmem>>, vector<1x32xf32>
    %12 = vector.broadcast %11 : vector<1x32xf32> to vector<16x32xf32>
    %13 = arith.addf %10, %12 : vector<16x32xf32>
    %14 = arith.truncf %13 : vector<16x32xf32> to vector<16x32xbf16>
    %c0_12 = arith.constant 0 : index
    %c0_13 = arith.constant 0 : index
    %15 = vector.load %arg9[%c0_12, %c0_13] : memref<16x32xbf16, #tpu.memory_space<vmem>>, vector<16x32xbf16>
    tpu.vector_store %arg9[%c0_12, %c0_13], %14 {strides = array<i32>} : memref<16x32xbf16, #tpu.memory_space<vmem>>, vector<16x32xbf16>,
    %c0_14 = arith.constant 0 : index
    %c0_15 = arith.constant 0 : index
    %16 = vector.load %arg4[%c0_14, %c0_15] : memref<32x32xbf16, #tpu.memory_space<vmem>>, vector<32x32xbf16>
    %cst_16 = arith.constant dense<0.000000e+00> : vector<16x32xf32>
    %17 = tpu.matmul %1, %16, %cst_16 {dimension_numbers = #tpu.dot_dimension_numbers<[1], [0], [0], [1], [0, 0, 1, 1], [], []>} : vector<16x32xbf16>, vector<32x32xbf16>, vector<16x32xf32> -> vector<16x32xf32>
    %c0_17 = arith.constant 0 : index
    %c0_18 = arith.constant 0 : index
    %18 = vector.load %arg7[%c0_17, %c0_18] : memref<1x32xf32, #tpu.memory_space<vmem>>, vector<1x32xf32>
    %19 = vector.broadcast %18 : vector<1x32xf32> to vector<16x32xf32>
    %20 = arith.addf %17, %19 : vector<16x32xf32>
    %21 = arith.truncf %20 : vector<16x32xf32> to vector<16x32xbf16>
    %c0_19 = arith.constant 0 : index
    %c0_20 = arith.constant 0 : index
    %22 = vector.load %arg10[%c0_19, %c0_20] : memref<16x32xbf16, #tpu.memory_space<vmem>>, vector<16x32xbf16>
    tpu.vector_store %arg10[%c0_19, %c0_20], %21 {strides = array<i32>} : memref<16x32xbf16, #tpu.memory_space<vmem>>, vector<16x32xbf16>,
    return
  }
  func.func @transform_0(%arg0: i32) -> (i32, i32) {
    %c0_i32 = arith.constant 0 : i32
    %c0_i32_0 = arith.constant 0 : i32
    return %arg0, %c0_i32 : i32, i32
  }
  func.func @transform_1(%arg0: i32) -> (i32, i32) {
    %c0_i32 = arith.constant 0 : i32
    %c0_i32_0 = arith.constant 0 : i32
    %c0_i32_1 = arith.constant 0 : i32
    return %c0_i32, %c0_i32_0 : i32, i32
  }
  func.func @transform_2(%arg0: i32) -> (i32, i32) {
    %c0_i32 = arith.constant 0 : i32
    %c0_i32_0 = arith.constant 0 : i32
    %c0_i32_1 = arith.constant 0 : i32
    return %c0_i32, %c0_i32_0 : i32, i32
  }
  func.func @transform_3(%arg0: i32) -> (i32, i32) {
    %c0_i32 = arith.constant 0 : i32
    %c0_i32_0 = arith.constant 0 : i32
    %c0_i32_1 = arith.constant 0 : i32
    return %c0_i32, %c0_i32_0 : i32, i32
  }
  func.func @transform_4(%arg0: i32) -> (i32, i32) {
    %c0_i32 = arith.constant 0 : i32
    %c0_i32_0 = arith.constant 0 : i32
    %c0_i32_1 = arith.constant 0 : i32
    return %c0_i32, %c0_i32_0 : i32, i32
  }
  func.func @transform_5(%arg0: i32) -> (i32, i32) {
    %c0_i32 = arith.constant 0 : i32
    %c0_i32_0 = arith.constant 0 : i32
    %c0_i32_1 = arith.constant 0 : i32
    return %c0_i32, %c0_i32_0 : i32, i32
  }
  func.func @transform_6(%arg0: i32) -> (i32, i32) {
    %c0_i32 = arith.constant 0 : i32
    %c0_i32_0 = arith.constant 0 : i32
    %c0_i32_1 = arith.constant 0 : i32
    return %c0_i32, %c0_i32_0 : i32, i32
  }
  func.func @transform_7(%arg0: i32) -> (i32, i32) {
    %c0_i32 = arith.constant 0 : i32
    %c0_i32_0 = arith.constant 0 : i32
    return %arg0, %c0_i32 : i32, i32
  }
  func.func @transform_8(%arg0: i32) -> (i32, i32) {
    %c0_i32 = arith.constant 0 : i32
    %c0_i32_0 = arith.constant 0 : i32
    return %arg0, %c0_i32 : i32, i32
  }
  func.func @transform_9(%arg0: i32) -> (i32, i32) {
    %c0_i32 = arith.constant 0 : i32
    %c0_i32_0 = arith.constant 0 : i32
    return %arg0, %c0_i32 : i32, i32
  }
}

</mosaic_0001>

<bundles_post_ra>
// kernel: tpu_custom_call.1
= control target key start
LH: loop header
LB: loop body
LE: loop exit
PB: predicated region body
PF: predicated region fallthrough
CT: control target
= control target key end

     0   :  { %15 = vsyncpa [#allocation3], 0  ;;  %s613_s0 = inlined_call_operand.hbm [shape: f32[16,32], index: 0, kind: input, shape index: {}]   ;;  %s614_s1 = inlined_call_operand.hbm [shape: bf16[32,32], index: 1, kind: input, shape index: {}]   ;;  %s615_s2 = inlined_call_operand.hbm [shape: bf16[32,32], index: 2, kind: input, shape index: {}]   ;;  %s616_s3 = inlined_call_operand.hbm [shape: bf16[32,32], index: 3, kind: input, shape index: {}]   ;;  %s617_s4 = inlined_call_operand.vmem [shape: f32[1,32], index: 4, kind: input, shape index: {}]   ;;  %s618_s5 = inlined_call_operand.vmem [shape: f32[1,32], index: 5, kind: input, shape index: {}]   ;;  %s619_s6 = inlined_call_operand.vmem [shape: f32[1,32], index: 6, kind: input, shape index: {}]   ;;  %s620_s7 = inlined_call_operand.hbm [shape: bf16[16,32], index: 7, kind: output, shape index: {0}]   ;;  %s621_s8 = inlined_call_operand.hbm [shape: bf16[16,32], index: 8, kind: output, shape index: {1}]   ;;  %s622_s9 = inlined_call_operand.hbm [shape: bf16[16,32], index: 9, kind: output, shape index: {2}]  }
   0x1   :  { %16 = vsyncpa [#allocation6], 0 }
   0x2   :  { %17 = vsyncpa [#allocation9], 0 }
   0x3   :  { %18 = vsyncpa [#allocation4], 0  ;;  %s37_s11 = sshll.u32 %s614_s1, 4  ;;  %s38_s11 = int_to_ptr.hbm [resolvable:$true] %s37_s11 }
   0x4   :  { %19 = vsyncpa [#allocation12], 0  ;;  %s498_s12 = smov [#allocation5]   ;;  %s24_s16 = sshll.u32 %s613_s0, 4  ;;  %s25_s16 = int_to_ptr.hbm [resolvable:$true] %s24_s16 }
   0x5   :  { %s39_s13 = sshll.u32 %s498_s12, 4  ;;  %s499_s17 = smov 64   ;;  %s40_s13 = int_to_ptr.vmem [resolvable:$true] %s39_s13 }
   0x6   :  { %s500_s18 = smov 4   ;;  %s501_s19 = smov [#allocation2]  }
   0x7   :  { %45 = dma.hbm_to_vmem [thread:$0]  %s38_s11, 256, %s40_s13, [#allocation6], %s499_s17, %s499_s17, %s500_s18  }
   0x8   :  { %s26_s20 = sshll.u32 %s501_s19, 4  ;;  %s502_s1 = smov 128   ;;  %s27_s20 = int_to_ptr.vmem [resolvable:$true] %s26_s20 }
   0x9   :  { %s503_s21 = smov 8   ;;  %s50_s24 = sshll.u32 %s615_s2, 4  ;;  %s51_s24 = int_to_ptr.hbm [resolvable:$true] %s50_s24 }
   0xa   :  { %32 = dma.hbm_to_vmem [thread:$0]  %s25_s16, 256, %s27_s20, [#allocation3], %s502_s1, %s502_s1, %s503_s21  }
   0xb   :  { %s504_s25 = smov [#allocation7]   ;;  %s63_s28 = sshll.u32 %s616_s3, 4  ;;  %s64_s28 = int_to_ptr.hbm [resolvable:$true] %s63_s28 }
   0xc   :  { %s52_s0 = sshll.u32 %s504_s25, 4  ;;  %s505_s29 = smov [#allocation8]   ;;  %s53_s0 = int_to_ptr.vmem [resolvable:$true] %s52_s0 }
   0xd   :  { %58 = dma.hbm_to_vmem [thread:$0]  %s51_s24, 256, %s53_s0, [#allocation6], %s499_s17, %s499_s17, %s500_s18  }
   0xe   :  { %s65_s30 = sshll.u32 %s505_s29, 4  ;;  %s66_s30 = int_to_ptr.vmem [resolvable:$true] %s65_s30 }
   0xf   :  { %71 = dma.hbm_to_vmem [thread:$0]  %s64_s28, 256, %s66_s30, [#allocation9], %s499_s17, %s499_s17, %s500_s18  }
  0x10   :  { %488 = dma.done.wait [#allocation3], 256  }
  0x11   :  { %489 = vsyncadd [#allocation3], 4294967040 }
  0x12   :  { %490 = dma.done.wait [#allocation6], 512  }
  0x13   :  { %491 = vsyncadd [#allocation6], 4294966784 }
  0x14   :  { %492 = dma.done.wait [#allocation9], 256  }
  0x15   :  { %493 = vsyncadd [#allocation9], 4294967040  ;;  %v301_v0 = vld [vmem:[#allocation5 + $0x8] sm:$0xff]  ;;  %v303_v1 = vld [vmem:[#allocation7 + $0x8] sm:$0xff]  ;;  %vm118_vm0 = vcmask 261120   ;;  %vm138_vm1 = vcmask 257024  }
  0x16   :  { %v305_v2 = vld [vmem:[#allocation8 + $0x8] sm:$0xff]  ;;  %v300_v3 = vld [vmem:[#allocation5] sm:$0xff]  ;;  %v302_v4 = vld [vmem:[#allocation7] sm:$0xff]  ;;  %128 = vmatpush.bf16.msra.mxu0 %v301_v0  ;;  %167 = vmatpush.bf16.msra.mxu1 %v303_v1  ;;  %s223_s16 = sshll.u32 %s620_s7, 4  ;;  %s507_s19 = smov [#allocation11]   ;;  %s224_s16 = int_to_ptr.hbm [resolvable:$true] %s223_s16 }
  0x17   :  { %v95_v5 = vld [vmem:[#allocation2] sm:$0xff]  ;;  %v96_v6 = vld [vmem:[#allocation2 + $0x8] sm:$0xff]  ;;  %205 = vmatpush.bf16.msra.mxu2 %v305_v2  ;;  %v304_v7 = vld [vmem:[#allocation8] sm:$0xff]  ;;  %s234_s20 = sshll.u32 %s507_s19, 4  ;;  %s236_s21 = sshll.u32 %s621_s8, 4  ;;  %s235_s20 = int_to_ptr.vmem [resolvable:$true] %s234_s20  ;;  %s237_s21 = int_to_ptr.hbm [resolvable:$true] %s236_s21 }
  0x18   :  { %v97_v8 = vpack.c.bf16 %v96_v6, %v95_v5  ;;  %v317_v9 = vld [vmem:[%s617_s4] ss:$0 sm:$0xff]  ;;  %s506_s4 = smov [#allocation10]   ;;  %s508_s7 = smov [#allocation13]  }
  0x19   :  { %v318_v10 = vld [vmem:[%s618_s5] ss:$0 sm:$0xff]  ;;  %s221_s5 = sshll.u32 %s506_s4, 4  ;;  %s247_s22 = sshll.u32 %s508_s7, 4  ;;  %s222_s5 = int_to_ptr.vmem [resolvable:$true] %s221_s5  ;;  %s248_s22 = int_to_ptr.vmem [resolvable:$true] %s247_s22 }
  0x1a   :  { %129 = vmatpush.bf16.msra.mxu0 %v300_v3  ;;  %168 = vmatpush.bf16.msra.mxu1 %v302_v4  ;;  %v319_v17 = vld [vmem:[%s619_s6] ss:$0 sm:$0xff]  ;;  %s249_s25 = sshll.u32 %s622_s9, 4  ;;  %s250_s25 = int_to_ptr.hbm [resolvable:$true] %s249_s25 }
  0x1b   :  { %206 = vmatpush.bf16.msra.mxu2 %v304_v7 }
  0x1d   :  { %281 = vmatmul.msk.bf16.vlgmr.msra.gmra.mxu0 %vm118_vm0, %v97_v8  ;;  %290 = vmatmul.msk.bf16.vlgmr.msra.gmra.mxu1 %vm118_vm0, %v97_v8 }
  0x1e   :  { %299 = vmatmul.msk.bf16.vlgmr.msra.gmra.mxu2 %vm118_vm0, %v97_v8 }
  0x9a   :  { %v131_v11 = vpop.f32.mrf.mxu0  ;;  %v170_v12 = vpop.f32.mrf.mxu1 }
  0x9b   :  { %v132_v13 = vadd.f32 %v317_v9, %v131_v11  ;;  %v171_v14 = vadd.f32 %v318_v10, %v170_v12 }
  0x9d   :  { %v136_v15 = vpack.c.bf16 %v132_v13, %v132_v13  ;;  %v175_v16 = vpack.c.bf16 %v171_v14, %v171_v14 }
  0x9f   :  { %139 = vst.msk [vmem:[#allocation10] sm:$0xf] %vm138_vm1, %v136_v15 }
  0xa0   :  { %177 = vst.msk [vmem:[#allocation11] sm:$0xf] %vm138_vm1, %v175_v16 }
  0xa1   :  { %v208_v18 = vpop.f32.mrf.mxu2 }
  0xa2   :  { %v209_v19 = vadd.f32 %v319_v17, %v208_v18  ;;  %v133_v20 = vpop.f32.mrf.mxu0  ;;  %v172_v21 = vpop.f32.mrf.mxu1 }
  0xa3   :  { %v134_v22 = vadd.f32 %v317_v9, %v133_v20  ;;  %v173_v23 = vadd.f32 %v318_v10, %v172_v21 }
  0xa4   :  { %v213_v24 = vpack.c.bf16 %v209_v19, %v209_v19 }
  0xa5   :  { %v137_v25 = vpack.c.bf16 %v134_v22, %v134_v22  ;;  %v176_v26 = vpack.c.bf16 %v173_v23, %v173_v23 }
  0xa6   :  { %215 = vst.msk [vmem:[#allocation13] sm:$0xf] %vm138_vm1, %v213_v24 }
  0xa7   :  { %140 = vst.msk [vmem:[#allocation10 + $0x4] sm:$0xf] %vm138_vm1, %v137_v25 }
  0xa8   :  { %178 = vst.msk [vmem:[#allocation11 + $0x4] sm:$0xf] %vm138_vm1, %v176_v26  ;;  %229 = dma.vmem_to_hbm [thread:$0]  %s222_s5, 128, %s224_s16, [#allocation4], %s499_s17, %s499_s17, %s500_s18  }
  0xa9   :  { %v210_v27 = vpop.f32.mrf.mxu2  ;;  %242 = dma.vmem_to_hbm [thread:$0]  %s235_s20, 128, %s237_s21, [#allocation12], %s499_s17, %s499_s17, %s500_s18  }
  0xaa   :  { %v211_v28 = vadd.f32 %v319_v17, %v210_v27 }
  0xac   :  { %v214_v29 = vpack.c.bf16 %v211_v28, %v211_v28 }
  0xae   :  { %216 = vst.msk [vmem:[#allocation13 + $0x4] sm:$0xf] %vm138_vm1, %v214_v29 }
  0xaf   :  { %255 = dma.vmem_to_hbm [thread:$0]  %s248_s22, 128, %s250_s25, [#allocation12], %s499_s17, %s499_s17, %s500_s18  }
  0xb0   :  { %494 = dma.done.wait [#allocation4], 128  }
  0xb1   :  { %495 = vsyncadd [#allocation4], 4294967168 }
  0xb2   :  { %496 = dma.done.wait [#allocation12], 256  }
  0xb3   :  { %497 = vsyncadd [#allocation12], 4294967040 }
  0xb4   :  { %268 = vsyncpa [#allocation3], 1 }
  0xb5   :  { %269 = vsyncpa [#allocation6], 1 }
  0xb6   :  { %270 = vsyncpa [#allocation9], 1 }
  0xb7   :  { %271 = vsyncpa [#allocation4], 1 }
  0xb8   :  { %272 = vsyncpa [#allocation12], 1 }

</bundles_post_ra>
